<compile_context>
chip_gen: v6e
topology: v6e:2x2x1
jax: 0.10.0
libtpu: 0.0.40
codegen_flags: <defaults>
</compile_context>

<pallas_src>
import functools

import numpy as np
import jax
import jax.numpy as jnp
from jax.experimental import pallas as pl
from jax.experimental.pallas import tpu as pltpu


def _round_up(x, m):
    return (x + m - 1) // m * m


def _make_mlp_kernel(num_hidden, final_sigmoid):
    """Fused MLP: num_hidden x (Linear + LeakyReLU(0.2)) + final Linear (+Sigmoid).

    Matmuls run on the MXU in bf16 with f32 accumulation; bias add, LeakyReLU
    and the sigmoid are done in f32 on the VPU/EUP.
    """

    def kernel(*refs):
        # refs layout: x, (w, b) * num_hidden, w_out, b_out, out
        x_ref = refs[0]
        out_ref = refs[-1]
        params = refs[1:-1]

        h = x_ref[...]  # bf16 (TM, D_in)
        idx = 0
        for _ in range(num_hidden):
            w = params[idx][...]        # bf16 (D_prev, D_next_pad)
            b = params[idx + 1][...]    # f32  (1, D_next_pad)
            idx += 2
            z = jnp.dot(h, w, preferred_element_type=jnp.float32) + b
            z = jnp.where(z >= 0, z, 0.2 * z)  # LeakyReLU(0.2), f32
            # TODO(synk): Dropout(0.5) is identity in eval mode; training-mode
            # stochastic dropout (RNG) is intentionally not emitted.
            h = z.astype(jnp.bfloat16)

        w = params[idx][...]
        b = params[idx + 1][...]
        o = jnp.dot(h, w, preferred_element_type=jnp.float32) + b
        if final_sigmoid:
            o = jax.nn.sigmoid(o)
        out_ref[...] = o.astype(out_ref.dtype)

    return kernel


class ClassifierPallas:
    """JAX/Pallas port of the ctabgan_synthesizer classifier-head forward."""

    def __init__(self, input_dim, dis_dims, st_ed, key):
        st, ed = int(st_ed[0]), int(st_ed[1])
        self.st_ed = (st, ed)
        width = ed - st
        dim = input_dim - width

        if width == 1:
            out_dim, final_sigmoid = 1, False
        elif width == 2:
            out_dim, final_sigmoid = 1, True
        else:
            out_dim, final_sigmoid = width, False

        self.input_dim = input_dim
        self.width = width
        self.out_dim = out_dim
        self.final_sigmoid = final_sigmoid
        self.num_hidden = len(dis_dims)

        LANE = 128
        logical_dims = [dim] + list(dis_dims) + [out_dim]
        # Padded feature dims presented to the kernel:
        #  * layer-0 fan_in is the FULL input_dim (label columns get zero weight
        #    rows, fusing the column-drop/concat into the first GEMM),
        #  * every other dim is lane-padded to a multiple of 128 so vregs are
        #    dense and the output writeback is an unmasked, lane-dense store.
        padded_dims = [input_dim] + [_round_up(d, LANE) for d in logical_dims[1:]]
        self.padded_dims = padded_dims
        self.out_pad = padded_dims[-1]

        params = []          # bf16 weights + f32 biases (padded) fed to the kernel
        logical_params = []  # unpadded f32 copies for the pure-JAX reference
        keys = jax.random.split(key, 2 * (len(logical_dims) - 1))
        for li in range(len(logical_dims) - 1):
            fan_in, fan_out = logical_dims[li], logical_dims[li + 1]
            bound = 1.0 / float(np.sqrt(fan_in))
            w = jax.random.uniform(
                keys[2 * li], (fan_in, fan_out), jnp.float32, -bound, bound
            )
            b = jax.random.uniform(
                keys[2 * li + 1], (1, fan_out), jnp.float32, -bound, bound
            )
            logical_params.append((w, b))

            w_pad = jnp.zeros((padded_dims[li], padded_dims[li + 1]), jnp.float32)
            if li == 0:
                # Embed with zero rows at [st, ed):
                #   x_full @ w_pad == concat(x[:, :st], x[:, ed:]) @ w
                w_pad = w_pad.at[:st, :fan_out].set(w[:st])
                w_pad = w_pad.at[ed:, :fan_out].set(w[st:])
            else:
                w_pad = w_pad.at[:fan_in, :fan_out].set(w)
            b_pad = (
                jnp.zeros((1, padded_dims[li + 1]), jnp.float32)
                .at[:, :fan_out]
                .set(b)
            )
            params += [w_pad.astype(jnp.bfloat16), b_pad]

        self.flat_params = params
        self.logical_params = logical_params

        kernel = _make_mlp_kernel(self.num_hidden, self.final_sigmoid)
        out_pad = self.out_pad

        def forward(x, flat_params):
            B = x.shape[0]

            # Label extraction (same semantics as the reference forward).
            if width == 1:
                label = x[:, st:ed]
            else:
                label = jnp.argmax(x[:, st:ed], axis=-1)

            # Batch tile: big enough to fill the MXU M-dim / amortize per-step
            # overhead, small enough to stay well under scoped VMEM on v7x.
            if B >= 1024:
                tm = 1024
            elif B >= 256:
                tm = 256
            else:
                tm = _round_up(B, 8)
            b_pad = _round_up(B, tm)

            x_p = x if b_pad == B else jnp.pad(x, ((0, b_pad - B), (0, 0)))
            x_p = x_p.astype(jnp.bfloat16)

            grid = (b_pad // tm,)
            in_specs = [pl.BlockSpec((tm, input_dim), lambda i: (i, 0))]
            for p in flat_params:
                # Constant block index -> weights/biases stay VMEM-resident
                # across batch-grid steps (no re-DMA).
                in_specs.append(pl.BlockSpec(p.shape, lambda i: (0, 0)))
            out_spec = pl.BlockSpec((tm, out_pad), lambda i: (i, 0))

            flops = 2 * b_pad * sum(
                padded_dims[k] * padded_dims[k + 1]
                for k in range(len(padded_dims) - 1)
            )
            param_bytes = sum(
                int(np.prod(p.shape)) * p.dtype.itemsize for p in flat_params
            )
            bytes_accessed = (
                b_pad * input_dim * 2 + param_bytes + b_pad * out_pad * 4
            )
            transcendentals = b_pad * out_pad if final_sigmoid else 0

            out = pl.pallas_call(
                kernel,
                out_shape=jax.ShapeDtypeStruct((b_pad, out_pad), jnp.float32),
                grid=grid,
                in_specs=in_specs,
                out_specs=out_spec,
                compiler_params=pltpu.CompilerParams(
                    dimension_semantics=("parallel",),
                    vmem_limit_bytes=32 * 1024 * 1024,
                ),
                cost_estimate=pl.CostEstimate(
                    flops=flops,
                    transcendentals=transcendentals,
                    bytes_accessed=bytes_accessed,
                ),
            )(x_p, *flat_params)

            logits = out[:B, :out_dim]
            if width in (1, 2):
                return logits.reshape(-1), label
            return logits, label

        self._forward = jax.jit(forward)

    def __call__(self, x):
        return self._forward(x, tuple(self.flat_params))


def _reference_forward(clf, x):
    """Pure-JAX f32 reference (matches the PyTorch module semantics)."""
    st, ed = clf.st_ed
    width = clf.width
    if width == 1:
        label = x[:, st:ed]
    else:
        label = jnp.argmax(x[:, st:ed], axis=-1)
    h = jnp.concatenate([x[:, :st], x[:, ed:]], axis=1)
    n = clf.num_hidden
    for li, (w, b) in enumerate(clf.logical_params):
        h = h @ w + b
        if li < n:
            h = jnp.where(h >= 0, h, 0.2 * h)
    if clf.final_sigmoid:
        h = jax.nn.sigmoid(h)
    if width in (1, 2):
        return h.reshape(-1), label
    return h, label


if __name__ == "__main__":
    key = jax.random.PRNGKey(0)
    k_data, k_params = jax.random.split(key)

    # Small shapes consistent with the module: tabular rows of width input_dim,
    # a 2-wide one-hot target slice at columns [10, 12) -> binary sigmoid head.
    batch = 8
    input_dim = 32
    st_ed = (10, 12)
    dis_dims = (32, 16)

    x = jax.random.normal(k_data, (batch, input_dim), dtype=jnp.float32)

    clf = ClassifierPallas(input_dim, dis_dims, st_ed, k_params)
    out, label = clf(x)
    out = jax.block_until_ready(out)
    label = jax.block_until_ready(label)

    # Shape / semantics checks (width==2 path: flattened sigmoid output).
    assert out.shape == (batch,)
    assert label.shape == (batch,)
    assert bool(jnp.all((out >= 0.0) & (out <= 1.0)))

    # Numerical check against a pure-JAX f32 reference (bf16 matmul tolerance).
    ref_out, ref_label = _reference_forward(clf, x)
    assert bool(jnp.all(label == ref_label))
    assert np.allclose(np.asarray(out), np.asarray(ref_out), atol=3e-2, rtol=3e-2)

    print("KERNEL_OK")
</pallas_src>

<mosaic_0001>
module attributes {stable_mosaic.version = 11 : i64} {
  func.func @kernel(%arg0: i32, %arg1: memref<8x32xbf16, #tpu.memory_space<vmem>>, %arg2: memref<32x128xbf16, #tpu.memory_space<vmem>>, %arg3: memref<1x128xf32, #tpu.memory_space<vmem>>, %arg4: memref<128x128xbf16, #tpu.memory_space<vmem>>, %arg5: memref<1x128xf32, #tpu.memory_space<vmem>>, %arg6: memref<128x128xbf16, #tpu.memory_space<vmem>>, %arg7: memref<1x128xf32, #tpu.memory_space<vmem>>, %arg8: memref<8x128xf32, #tpu.memory_space<vmem>>) attributes {dimension_semantics = [#tpu.dimension_semantics<parallel>], iteration_bounds = array<i64: 1>, scalar_prefetch = 0 : i64, scratch_operands = 0 : i64, tpu.core_type = #tpu.core_type<tc>, window_params = [{transform_indices = @transform_0, window_bounds = array<i64: 8, 32>}, {pipeline_mode = #tpu.pipeline_mode<synchronous>, transform_indices = @transform_1, window_bounds = array<i64: 32, 128>}, {pipeline_mode = #tpu.pipeline_mode<synchronous>, transform_indices = @transform_2, window_bounds = array<i64: 1, 128>}, {pipeline_mode = #tpu.pipeline_mode<synchronous>, transform_indices = @transform_3, window_bounds = array<i64: 128, 128>}, {pipeline_mode = #tpu.pipeline_mode<synchronous>, transform_indices = @transform_4, window_bounds = array<i64: 1, 128>}, {pipeline_mode = #tpu.pipeline_mode<synchronous>, transform_indices = @transform_5, window_bounds = array<i64: 128, 128>}, {pipeline_mode = #tpu.pipeline_mode<synchronous>, transform_indices = @transform_6, window_bounds = array<i64: 1, 128>}, {transform_indices = @transform_7, window_bounds = array<i64: 8, 128>}]} {
    %c0 = arith.constant 0 : index
    %c0_0 = arith.constant 0 : index
    %0 = vector.load %arg1[%c0, %c0_0] : memref<8x32xbf16, #tpu.memory_space<vmem>>, vector<8x32xbf16>
    %c0_1 = arith.constant 0 : index
    %c0_2 = arith.constant 0 : index
    %1 = vector.load %arg2[%c0_1, %c0_2] : memref<32x128xbf16, #tpu.memory_space<vmem>>, vector<32x128xbf16>
    %c0_3 = arith.constant 0 : index
    %c0_4 = arith.constant 0 : index
    %2 = vector.load %arg3[%c0_3, %c0_4] : memref<1x128xf32, #tpu.memory_space<vmem>>, vector<1x128xf32>
    %cst = arith.constant dense<0.000000e+00> : vector<8x128xf32>
    %3 = tpu.matmul %0, %1, %cst {dimension_numbers = #tpu.dot_dimension_numbers<[1], [0], [0], [1], [0, 0, 1, 1], [], []>} : vector<8x32xbf16>, vector<32x128xbf16>, vector<8x128xf32> -> vector<8x128xf32>
    %4 = vector.broadcast %2 : vector<1x128xf32> to vector<8x128xf32>
    %5 = arith.addf %3, %4 : vector<8x128xf32>
    %cst_5 = arith.constant 0.000000e+00 : f32
    %6 = vector.broadcast %cst_5 : f32 to vector<8x128xf32>
    %7 = arith.cmpf oge, %5, %6 : vector<8x128xf32>
    %cst_6 = arith.constant 2.000000e-01 : f32
    %8 = vector.broadcast %cst_6 : f32 to vector<8x128xf32>
    %9 = arith.mulf %8, %5 : vector<8x128xf32>
    %10 = arith.select %7, %5, %9 : vector<8x128xi1>, vector<8x128xf32>
    %11 = arith.truncf %10 : vector<8x128xf32> to vector<8x128xbf16>
    %c0_7 = arith.constant 0 : index
    %c0_8 = arith.constant 0 : index
    %12 = vector.load %arg4[%c0_7, %c0_8] : memref<128x128xbf16, #tpu.memory_space<vmem>>, vector<128x128xbf16>
    %c0_9 = arith.constant 0 : index
    %c0_10 = arith.constant 0 : index
    %13 = vector.load %arg5[%c0_9, %c0_10] : memref<1x128xf32, #tpu.memory_space<vmem>>, vector<1x128xf32>
    %cst_11 = arith.constant dense<0.000000e+00> : vector<8x128xf32>
    %14 = tpu.matmul %11, %12, %cst_11 {dimension_numbers = #tpu.dot_dimension_numbers<[1], [0], [0], [1], [0, 0, 1, 1], [], []>} : vector<8x128xbf16>, vector<128x128xbf16>, vector<8x128xf32> -> vector<8x128xf32>
    %15 = vector.broadcast %13 : vector<1x128xf32> to vector<8x128xf32>
    %16 = arith.addf %14, %15 : vector<8x128xf32>
    %cst_12 = arith.constant 0.000000e+00 : f32
    %17 = vector.broadcast %cst_12 : f32 to vector<8x128xf32>
    %18 = arith.cmpf oge, %16, %17 : vector<8x128xf32>
    %cst_13 = arith.constant 2.000000e-01 : f32
    %19 = vector.broadcast %cst_13 : f32 to vector<8x128xf32>
    %20 = arith.mulf %19, %16 : vector<8x128xf32>
    %21 = arith.select %18, %16, %20 : vector<8x128xi1>, vector<8x128xf32>
    %22 = arith.truncf %21 : vector<8x128xf32> to vector<8x128xbf16>
    %c0_14 = arith.constant 0 : index
    %c0_15 = arith.constant 0 : index
    %23 = vector.load %arg6[%c0_14, %c0_15] : memref<128x128xbf16, #tpu.memory_space<vmem>>, vector<128x128xbf16>
    %c0_16 = arith.constant 0 : index
    %c0_17 = arith.constant 0 : index
    %24 = vector.load %arg7[%c0_16, %c0_17] : memref<1x128xf32, #tpu.memory_space<vmem>>, vector<1x128xf32>
    %cst_18 = arith.constant dense<0.000000e+00> : vector<8x128xf32>
    %25 = tpu.matmul %22, %23, %cst_18 {dimension_numbers = #tpu.dot_dimension_numbers<[1], [0], [0], [1], [0, 0, 1, 1], [], []>} : vector<8x128xbf16>, vector<128x128xbf16>, vector<8x128xf32> -> vector<8x128xf32>
    %26 = vector.broadcast %24 : vector<1x128xf32> to vector<8x128xf32>
    %27 = arith.addf %25, %26 : vector<8x128xf32>
    %28 = arith.negf %27 : vector<8x128xf32>
    %29 = math.exp %28 : vector<8x128xf32>
    %cst_19 = arith.constant 1.000000e+00 : f32
    %30 = vector.broadcast %cst_19 : f32 to vector<8x128xf32>
    %31 = arith.addf %30, %29 : vector<8x128xf32>
    %32 = arith.divf %30, %31 : vector<8x128xf32>
    %c0_20 = arith.constant 0 : index
    %c0_21 = arith.constant 0 : index
    %33 = vector.load %arg8[%c0_20, %c0_21] : memref<8x128xf32, #tpu.memory_space<vmem>>, vector<8x128xf32>
    tpu.vector_store %arg8[%c0_20, %c0_21], %32 {strides = array<i32>} : memref<8x128xf32, #tpu.memory_space<vmem>>, vector<8x128xf32>,
    return
  }
  func.func @transform_0(%arg0: i32) -> (i32, i32) {
    %c0_i32 = arith.constant 0 : i32
    %c0_i32_0 = arith.constant 0 : i32
    return %arg0, %c0_i32 : i32, i32
  }
  func.func @transform_1(%arg0: i32) -> (i32, i32) {
    %c0_i32 = arith.constant 0 : i32
    %c0_i32_0 = arith.constant 0 : i32
    %c0_i32_1 = arith.constant 0 : i32
    return %c0_i32, %c0_i32_0 : i32, i32
  }
  func.func @transform_2(%arg0: i32) -> (i32, i32) {
    %c0_i32 = arith.constant 0 : i32
    %c0_i32_0 = arith.constant 0 : i32
    %c0_i32_1 = arith.constant 0 : i32
    return %c0_i32, %c0_i32_0 : i32, i32
  }
  func.func @transform_3(%arg0: i32) -> (i32, i32) {
    %c0_i32 = arith.constant 0 : i32
    %c0_i32_0 = arith.constant 0 : i32
    %c0_i32_1 = arith.constant 0 : i32
    return %c0_i32, %c0_i32_0 : i32, i32
  }
  func.func @transform_4(%arg0: i32) -> (i32, i32) {
    %c0_i32 = arith.constant 0 : i32
    %c0_i32_0 = arith.constant 0 : i32
    %c0_i32_1 = arith.constant 0 : i32
    return %c0_i32, %c0_i32_0 : i32, i32
  }
  func.func @transform_5(%arg0: i32) -> (i32, i32) {
    %c0_i32 = arith.constant 0 : i32
    %c0_i32_0 = arith.constant 0 : i32
    %c0_i32_1 = arith.constant 0 : i32
    return %c0_i32, %c0_i32_0 : i32, i32
  }
  func.func @transform_6(%arg0: i32) -> (i32, i32) {
    %c0_i32 = arith.constant 0 : i32
    %c0_i32_0 = arith.constant 0 : i32
    %c0_i32_1 = arith.constant 0 : i32
    return %c0_i32, %c0_i32_0 : i32, i32
  }
  func.func @transform_7(%arg0: i32) -> (i32, i32) {
    %c0_i32 = arith.constant 0 : i32
    %c0_i32_0 = arith.constant 0 : i32
    return %arg0, %c0_i32 : i32, i32
  }
}

</mosaic_0001>

<bundles_post_ra>
// kernel: forward.1
= control target key start
LH: loop header
LB: loop body
LE: loop exit
PB: predicated region body
PF: predicated region fallthrough
CT: control target
= control target key end

     0   :  { %12 = vsyncpa [#allocation3], 0  ;;  %s659_s0 = inlined_call_operand.vmem [shape: bf16[8,32], index: 0, kind: input, shape index: {}]   ;;  %s660_s1 = inlined_call_operand.hbm [shape: bf16[32,128], index: 1, kind: input, shape index: {}]   ;;  %s661_s2 = inlined_call_operand.vmem [shape: f32[1,128], index: 2, kind: input, shape index: {}]   ;;  %s662_s3 = inlined_call_operand.hbm [shape: bf16[128,128], index: 3, kind: input, shape index: {}]   ;;  %s663_s4 = inlined_call_operand.vmem [shape: f32[1,128], index: 4, kind: input, shape index: {}]   ;;  %s664_s5 = inlined_call_operand.hbm [shape: bf16[128,128], index: 5, kind: input, shape index: {}]   ;;  %s665_s6 = inlined_call_operand.vmem [shape: f32[1,128], index: 6, kind: input, shape index: {}]   ;;  %s666_s7 = inlined_call_operand.vmem [shape: f32[8,128], index: 7, kind: output, shape index: {}]  }
   0x1   :  { %13 = vsyncpa [#allocation5], 0  ;;  %s564_s24 = smov [#allocation4]   ;;  %s565_s26 = smov [#allocation2]  }
   0x2   :  { %s35_s25 = sshll.u32 %s564_s24, 4  ;;  %s21_s27 = sshll.u32 %s565_s26, 4  ;;  %s36_s25 = int_to_ptr.vmem [resolvable:$true] %s35_s25  ;;  %s22_s27 = int_to_ptr.vmem [resolvable:$true] %s21_s27 }
   0x3   :  { %s508_s28 = scalar_lea.vmem %s36_s25, 1024  ;;  %p513_p1 = scmp.lt.s32.totalorder %s36_s25, %s36_s25 }
   0x4   :  { %p509_p0 = scmp.ne.s32.totalorder %s36_s25, %s508_s28  ;;  %p514_p2 = scmp.lt.s32.totalorder %s508_s28, %s508_s28 }
   0x6   :  { %p515_p3 = por %p514_p2, %p513_p1 }
   0x8   :  { %p516_p4 = pnand %p515_p3, %p509_p0 }
   0xa   :  { %519 = shalt.err (!%p516_p4)
}
   0xb   :  { %s566_s29 = smov 64   ;;  %s567_s30 = smov 4  }
   0xc   :  { %41 = dma.hbm_to_vmem [thread:$0]  %s662_s3, 1024, %s36_s25, [#allocation5], %s566_s29, %s566_s29, %s567_s30  }
   0xd   :  { %s528_s10 = scalar_lea.vmem %s22_s27, 256  ;;  %p533_p6 = scmp.lt.s32.totalorder %s22_s27, %s22_s27 }
   0xe   :  { %p529_p5 = scmp.ne.s32.totalorder %s22_s27, %s528_s10  ;;  %p534_p7 = scmp.lt.s32.totalorder %s528_s10, %s528_s10 }
  0x10   :  { %p535_p8 = por %p534_p7, %p533_p6 }
  0x12   :  { %p536_p9 = pnand %p535_p8, %p529_p5 }
  0x14   :  { %539 = shalt.err (!%p536_p9)
}
  0x15   :  { %27 = dma.hbm_to_vmem [thread:$0]  %s660_s1, 256, %s22_s27, [#allocation3], %s566_s29, %s566_s29, %s567_s30  }
  0x16   :  { %s568_s13 = smov [#allocation6]  }
  0x17   :  { %s49_s14 = sshll.u32 %s568_s13, 4  ;;  %s50_s14 = int_to_ptr.vmem [resolvable:$true] %s49_s14 }
  0x18   :  { %s548_s15 = scalar_lea.vmem %s50_s14, 1024  ;;  %p553_p11 = scmp.lt.s32.totalorder %s50_s14, %s50_s14 }
  0x19   :  { %p549_p10 = scmp.ne.s32.totalorder %s50_s14, %s548_s15  ;;  %p554_p12 = scmp.lt.s32.totalorder %s548_s15, %s548_s15 }
  0x1b   :  { %p555_p13 = por %p554_p12, %p553_p11 }
  0x1d   :  { %p556_p0 = pnand %p555_p13, %p549_p10 }
  0x1f   :  { %559 = shalt.err (!%p556_p0)
}
  0x20   :  { %55 = dma.hbm_to_vmem [thread:$0]  %s664_s5, 1024, %s50_s14, [#allocation5], %s566_s29, %s566_s29, %s567_s30  }
  0x21   :  { %560 = dma.done.wait [#allocation3], 256  }
  0x22   :  { %561 = vsyncadd [#allocation3], 4294967040 }
  0x23   :  { %562 = dma.done.wait [#allocation5], 2048  }
  0x24   :  { %563 = vsyncadd [#allocation5], 4294965248  ;;  %v569_v0 = vmov 0.0   ;;  %vm570_vm0 = vmmov 0   ;;  %v478_v1 = vld [vmem:[#allocation2 + $0x8] sm:$0xff]   ;;  %v479_v2 = vld [vmem:[#allocation2] sm:$0xff]  }
  0x25   :  { %423 = vmatprep.subr.bf16.mxu0 %v569_v0  ;;  %427 = vmatprep.mubr.msk.bf16.mxu0 %vm570_vm0, %v569_v0  ;;  %v480_v3 = vld [vmem:[#allocation4 + $0x38] sm:$0xff]   ;;  %vm92_vm1 = vcmask 261120   ;;  %v481_v4 = vld [vmem:[#allocation4 + $0x30] sm:$0xff]   ;;  %v482_v6 = vld [vmem:[#allocation4 + $0x28] sm:$0xff]  }
  0x26   :  { %431 = vmatprep.subr.bf16.mxu1 %v569_v0  ;;  %447 = vmatprep.mubr.msk.bf16.mxu1 %vm570_vm0, %v569_v0  ;;  %v68_v5 = vld [vmem:[%s659_s0] sm:$0xf]  ;;  %v483_v7 = vld [vmem:[#allocation4 + $0x20] sm:$0xff]   ;;  %v484_v8 = vld [vmem:[#allocation4 + $0x18] sm:$0xff]  }
  0x27   :  { %424 = vmatpush3.bf16.msra.mxu0 %v478_v1  ;;  %432 = vmatpush3.bf16.msra.mxu1 %v480_v3  ;;  %v485_v9 = vld [vmem:[#allocation4 + $0x10] sm:$0xff]   ;;  %v486_v10 = vld [vmem:[#allocation4 + $0x8] sm:$0xff]   ;;  %v487_v11 = vld [vmem:[#allocation4] sm:$0xff]  }
  0x28   :  { %425 = vmatprep.subr.bf16.mxu0 %v569_v0  ;;  %433 = vmatprep.subr.bf16.mxu1 %v569_v0  ;;  %v488_v12 = vld [vmem:[#allocation6 + $0x38] sm:$0xff]   ;;  %v489_v13 = vld [vmem:[#allocation6 + $0x30] sm:$0xff]   ;;  %v490_v14 = vld [vmem:[#allocation6 + $0x28] sm:$0xff]  }
  0x29   :  { %v491_v15 = vld [vmem:[#allocation6 + $0x20] sm:$0xff]   ;;  %v492_v16 = vld [vmem:[#allocation6 + $0x18] sm:$0xff]   ;;  %v493_v17 = vld [vmem:[#allocation6 + $0x10] sm:$0xff]  }
  0x2a   :  { %v379_v18 = vld [vmem:[%s661_s2] ss:$0 sm:$0xff]  ;;  %v494_v27 = vld [vmem:[#allocation6 + $0x8] sm:$0xff]   ;;  %v495_v28 = vld [vmem:[#allocation6] sm:$0xff]  }
  0x2b   :  { %426 = vmatpush3.bf16.msra.mxu0 %v479_v2  ;;  %434 = vmatpush3.bf16.msra.mxu1 %v481_v4  ;;  %v383_v29 = vld [vmem:[%s663_s4] ss:$0 sm:$0xff] }
  0x2c   :  { %451 = vmatprep.subr.bf16.mxu0 %v569_v0  ;;  %435 = vmatprep.subr.bf16.mxu1 %v569_v0  ;;  %v392_v38 = vld [vmem:[%s665_s6] ss:$0 sm:$0xff] }
  0x2e   :  { %428 = vmatmul.mubr.msk.bf16.vlgmr.msra.gmra.mxu0 %vm92_vm1, %v68_v5 }
  0x2f   :  { %467 = vmatprep.mubr.msk.bf16.mxu0 %vm570_vm0, %v569_v0  ;;  %436 = vmatpush3.bf16.msra.mxu1 %v482_v6 }
  0x30   :  { %437 = vmatprep.subr.bf16.mxu1 %v569_v0  ;;  %452 = vmatpush3.bf16.msra.mxu0 %v488_v12 }
  0x31   :  { %453 = vmatprep.subr.bf16.mxu0 %v569_v0 }
  0x33   :  { %438 = vmatpush3.bf16.msra.mxu1 %v483_v7 }
  0x34   :  { %439 = vmatprep.subr.bf16.mxu1 %v569_v0  ;;  %454 = vmatpush3.bf16.msra.mxu0 %v489_v13 }
  0x35   :  { %455 = vmatprep.subr.bf16.mxu0 %v569_v0 }
  0x37   :  { %440 = vmatpush3.bf16.msra.mxu1 %v484_v8 }
  0x38   :  { %441 = vmatprep.subr.bf16.mxu1 %v569_v0  ;;  %456 = vmatpush3.bf16.msra.mxu0 %v490_v14 }
  0x39   :  { %457 = vmatprep.subr.bf16.mxu0 %v569_v0 }
  0x3b   :  { %442 = vmatpush3.bf16.msra.mxu1 %v485_v9 }
  0x3c   :  { %443 = vmatprep.subr.bf16.mxu1 %v569_v0  ;;  %458 = vmatpush3.bf16.msra.mxu0 %v491_v15 }
  0x3d   :  { %459 = vmatprep.subr.bf16.mxu0 %v569_v0 }
  0x3f   :  { %444 = vmatpush3.bf16.msra.mxu1 %v486_v10 }
  0x40   :  { %445 = vmatprep.subr.bf16.mxu1 %v569_v0  ;;  %460 = vmatpush3.bf16.msra.mxu0 %v492_v16 }
  0x41   :  { %461 = vmatprep.subr.bf16.mxu0 %v569_v0 }
  0x43   :  { %446 = vmatpush3.bf16.msra.mxu1 %v487_v11 }
  0x44   :  { %462 = vmatpush3.bf16.msra.mxu0 %v493_v17 }
  0x45   :  { %463 = vmatprep.subr.bf16.mxu0 %v569_v0 }
  0x48   :  { %464 = vmatpush3.bf16.msra.mxu0 %v494_v27 }
  0x49   :  { %465 = vmatprep.subr.bf16.mxu0 %v569_v0 }
  0x4c   :  { %466 = vmatpush3.bf16.msra.mxu0 %v495_v28 }
  0xee   :  { %v130_v19 = vpop.f32.mrf.mxu0 }
  0xef   :  { %v131_v20 = vadd.f32 %v379_v18, %v130_v19 }
  0xf0   :  { %v429_v21 = vpop.f32.mrf.mxu0 }
  0xf1   :  { %vm136_vm2 = vcmp.ge.f32.partialorder %v131_v20, 0.0  ;;  %v137_v22 = vmul.f32 0.2, %v131_v20 }
  0xf2   :  { %v133_v23 = vpop.f32.mrf.mxu0 }
  0xf3   :  { %v138_v24 = vsel %vm136_vm2, %v131_v20, %v137_v22 }
  0xf4   :  { %v430_v25 = vpop.f32.mrf.mxu0  ;;  %v139_v26 = vpack.c.bf16 %v138_v24, %v138_v24 }
  0xf6   :  { %448 = vmatmul.mubr.bf16.vlgmr.msra.gmra.mxu1 %v139_v26 }
 0x1b6   :  { %v245_v30 = vpop.f32.mrf.mxu1 }
 0x1b7   :  { %v246_v31 = vadd.f32 %v383_v29, %v245_v30 }
 0x1b8   :  { %v449_v32 = vpop.f32.mrf.mxu1 }
 0x1b9   :  { %vm251_vm3 = vcmp.ge.f32.partialorder %v246_v31, 0.0  ;;  %v252_v33 = vmul.f32 0.2, %v246_v31 }
 0x1ba   :  { %v248_v34 = vpop.f32.mrf.mxu1 }
 0x1bb   :  { %v253_v35 = vsel %vm251_vm3, %v246_v31, %v252_v33 }
 0x1bc   :  { %v254_v36 = vpack.c.bf16 %v253_v35, %v253_v35  ;;  %v450_v37 = vpop.f32.mrf.mxu1 }
 0x1be   :  { %468 = vmatmul.mubr.bf16.vlgmr.msra.gmra.mxu0 %v254_v36 }
 0x27e   :  { %v360_v39 = vpop.f32.mrf.mxu0 }
 0x27f   :  { %v361_v40 = vadd.f32 %v392_v38, %v360_v39 }
 0x280   :  { %v469_v41 = vpop.f32.mrf.mxu0 }
 0x281   :  { %v401_v42 = vmul.f32 -1.442695, %v361_v40 }
 0x282   :  { %v363_v43 = vpop.f32.mrf.mxu0 }
 0x283   :  { %496 = vpow2.f32 %v401_v42 }
 0x284   :  { %v470_v44 = vpop.f32.mrf.mxu0 }
 0x290   :  { %v497_v45 = vpop.eup %496 }
 0x291   :  { %v369_v46 = vadd.f32 1.0, %v497_v45 }
 0x293   :  { %498 = vrcp.f32 %v369_v46 }
 0x2a0   :  { %v499_v47 = vpop.eup %498 }
 0x2a1   :  { %372 = vst [vmem:[%s666_s7] sm:$0xff] %v499_v47 }
 0x2a2   :  { %377 = vsyncpa [#allocation3], 1 }
 0x2a3   :  { %378 = vsyncpa [#allocation5], 1 }

</bundles_post_ra>
